<compile_context>
chip_gen: v7x
topology: tpu7x:2x2x1
jax: 0.10.0
libtpu: 0.0.40
codegen_flags: <defaults>
</compile_context>

<pallas_src>
import functools

import jax
import jax.numpy as jnp
from jax.experimental import pallas as pl
from jax.experimental.pallas import tpu as pltpu


# ---------------------------------------------------------------------------
# Tunables (byte-based so bf16 inputs get the same block *bytes* as f32)
# ---------------------------------------------------------------------------
_PER_BUF_BYTES = 4 * 1024 * 1024      # target bytes per VMEM block buffer
_VMEM_LIMIT_BYTES = 48 * 1024 * 1024  # > v5e 16 MiB default, < v7x 64 MiB phys


# ---------------------------------------------------------------------------
# Kernels
# ---------------------------------------------------------------------------
def _elementwise_kernel(x_ref, o_ref, *, activation, alpha):
    x = x_ref[...]
    if activation == "lk_relu":
        y = jnp.where(x >= 0, x, alpha * x)
    elif activation == "relu":
        y = jnp.maximum(x, jnp.zeros_like(x))
    elif activation == "sigmoid":
        # Two-sided form (exp argument always <= 0) with a single reciprocal:
        # x >= 0: 1/(1+e^-x) = d ;  x < 0: e^x/(1+e^x) = 1 - d
        ex = jnp.exp(-jnp.abs(x))
        d = 1.0 / (1.0 + ex)
        y = jnp.where(x >= 0, d, 1.0 - d)
    elif activation == "tanh":
        y = jnp.tanh(x)
    elif activation == "selu":
        lam = 1.0507009873554804934193349852946   # PyTorch SELU constants
        a = 1.6732632423543772848170429916717
        y = lam * jnp.where(x > 0, x, a * (jnp.exp(x) - 1.0))
    else:  # identity
        y = x
    o_ref[...] = y.astype(o_ref.dtype)


def _softmax_channel_kernel(x_ref, o_ref):
    # Block = (TN, C, TL): channels on the sublane axis (axis=1), spatial tile
    # on the lanes -> 128 independent softmaxes per vreg column and unmasked
    # stores even for tiny C.  Exact divide keeps rows summing to 1.
    x = x_ref[...].astype(jnp.float32)
    m = jnp.max(x, axis=1, keepdims=True)
    e = jnp.exp(x - m)
    s = jnp.sum(e, axis=1, keepdims=True)
    o_ref[...] = (e / s).astype(o_ref.dtype)


# ---------------------------------------------------------------------------
# Elementwise wrapper
# ---------------------------------------------------------------------------
def _pick_lane(total, shape, ndim):
    """Lane width: largest 128-multiple dividing `total` (prefer >= 8 rows).
    If `total` is not 128-divisible, use the natural trailing dim as a
    full-extent lane axis -- no padding, still (8,128)-legal."""
    if total % 128 == 0:
        for cand in (4096, 2048, 1024, 512, 256, 128):
            if total % cand == 0 and total // cand >= 8:
                return cand
        for cand in (4096, 2048, 1024, 512, 256, 128):
            if total % cand == 0:
                return cand
    return shape[-1] if ndim >= 2 else total


def _pick_row_tile(m, lane, itemsize):
    """Row tile from a byte budget; multiple of 8 (or full extent); split into
    >= 2 grid steps when possible so v7x megacore can shard the grid."""
    tm = max(8, (_PER_BUF_BYTES // max(1, lane * itemsize)) // 8 * 8)
    tm = min(tm, m)
    if tm >= m and m > 8:
        half = -(-((m + 1) // 2) // 8) * 8   # ceil(ceil(m/2)/8)*8  (< m)
        tm = min(tm, half)
    return tm


def _run_elementwise(x, activation, alpha, donate=False):
    shape, dtype = x.shape, x.dtype
    itemsize = jnp.dtype(dtype).itemsize
    total = x.size
    if total == 0:
        return x

    lane = _pick_lane(total, shape, x.ndim)
    m = total // lane
    x2d = x.reshape(m, lane)                 # free view, no pad / extra pass
    tm = _pick_row_tile(m, lane, itemsize)

    flops_per = {"lk_relu": 2, "relu": 1, "sigmoid": 4,
                 "tanh": 2, "selu": 4}.get(activation, 1)
    trans_per = 1 if activation in ("sigmoid", "tanh", "selu") else 0
    cost = pl.CostEstimate(flops=flops_per * total,
                           transcendentals=trans_per * total,
                           bytes_accessed=2 * total * itemsize)

    kernel = functools.partial(_elementwise_kernel,
                               activation=activation, alpha=alpha)
    y2d = pl.pallas_call(
        kernel,
        out_shape=jax.ShapeDtypeStruct((m, lane), dtype),
        grid=(pl.cdiv(m, tm),),
        in_specs=[pl.BlockSpec((tm, lane), lambda i: (i, 0))],
        out_specs=pl.BlockSpec((tm, lane), lambda i: (i, 0)),
        compiler_params=pltpu.CompilerParams(
            dimension_semantics=("parallel",),
            vmem_limit_bytes=_VMEM_LIMIT_BYTES),
        cost_estimate=cost,
        input_output_aliases=({0: 0} if donate else {}),
    )(x2d)
    return y2d.reshape(shape)


# ---------------------------------------------------------------------------
# Channel-softmax wrapper
# ---------------------------------------------------------------------------
def _softmax_tiles(n, c, hw, itemsize):
    """VMEM-budget-driven (TN, TL) so each grid step moves ~_PER_BUF_BYTES."""
    if hw % 128 != 0:
        tl = hw                               # full-extent block (still legal)
    else:
        cap = max(128, (_PER_BUF_BYTES // max(1, c * itemsize)) // 128 * 128)
        if hw <= cap:
            tl = hw
        else:
            tl = 128
            t = 256
            while t <= cap:                   # largest 128-multiple divisor <= cap
                if hw % t == 0:
                    tl = t
                t += 128
    # When one spatial tile covers hw and c*hw is small, block over the batch
    # axis too so small-C inputs still move multi-MiB slabs per grid step.
    tn = 1
    if tl == hw:
        tn = min(n, max(1, _PER_BUF_BYTES // max(1, c * hw * itemsize)))
    # Guarantee >= 2 grid steps when possible so v7x megacore uses both cores.
    if pl.cdiv(n, tn) * pl.cdiv(hw, tl) < 2:
        if n > 1:
            tn = (n + 1) // 2
        elif tl == hw and hw % 256 == 0:
            tl = hw // 2
    return tn, tl


def _run_softmax_channels(x, donate=False):
    n, c, h, w = x.shape
    hw = h * w
    itemsize = jnp.dtype(x.dtype).itemsize
    x3 = x.reshape(n, c, hw)                  # free view: no transpose
    tn, tl = _softmax_tiles(n, c, hw, itemsize)

    total = n * c * hw
    cost = pl.CostEstimate(flops=5 * total, transcendentals=total,
                           bytes_accessed=2 * total * itemsize)

    y3 = pl.pallas_call(
        _softmax_channel_kernel,
        out_shape=jax.ShapeDtypeStruct((n, c, hw), x.dtype),
        grid=(pl.cdiv(n, tn), pl.cdiv(hw, tl)),
        in_specs=[pl.BlockSpec((tn, c, tl), lambda i, j: (i, 0, j))],
        out_specs=pl.BlockSpec((tn, c, tl), lambda i, j: (i, 0, j)),
        compiler_params=pltpu.CompilerParams(
            dimension_semantics=("parallel", "parallel"),
            vmem_limit_bytes=_VMEM_LIMIT_BYTES),
        cost_estimate=cost,
        input_output_aliases=({0: 0} if donate else {}),
    )(x3)
    return y3.reshape(n, c, h, w)


# ---------------------------------------------------------------------------
# Public entry point (ActivationLayer.forward equivalent)
# ---------------------------------------------------------------------------
_SUPPORTED = ("lk_relu", "relu", "softmax", "sigmoid", "tanh", "selu")


def activation_layer(x, activation="lk_relu", alpha_relu=0.15, donate=False):
    """JAX/Pallas equivalent of ActivationLayer.forward for NCHW input `x`.
    `donate=True` aliases the output onto the input buffer (only safe if the
    caller no longer needs `x`)."""
    if activation not in _SUPPORTED:
        return x  # self.activation is None -> identity (inplace flag is a no-op)
    if activation == "softmax":
        # nn.Softmax() with no dim on a 4-D input -> legacy dim=1 (channels).
        return _run_softmax_channels(x, donate=donate)
    return _run_elementwise(x, activation, alpha_relu, donate=donate)


# ---------------------------------------------------------------------------
# Reference + test
# ---------------------------------------------------------------------------
def _reference(x, activation, alpha):
    if activation == "lk_relu":
        return jnp.where(x >= 0, x, alpha * x)
    if activation == "relu":
        return jnp.maximum(x, 0)
    if activation == "sigmoid":
        return jax.nn.sigmoid(x)
    if activation == "tanh":
        return jnp.tanh(x)
    if activation == "selu":
        return jax.nn.selu(x)
    if activation == "softmax":
        return jax.nn.softmax(x, axis=1)
    return x


if __name__ == "__main__":
    key = jax.random.PRNGKey(0)
    x = jax.random.normal(key, (2, 4, 16, 16), dtype=jnp.float32)

    ok = True
    for act in ["lk_relu", "relu", "sigmoid", "tanh", "selu", "softmax", "none"]:
        y = activation_layer(x, activation=act, alpha_relu=0.15)
        y = jax.block_until_ready(y)
        ref = _reference(x, act, 0.15)
        if not jnp.allclose(y, ref, atol=1e-5, rtol=1e-5):
            ok = False
            print(f"MISMATCH for activation={act}")

    if ok:
        print("KERNEL_OK")
</pallas_src>

<mosaic_0001>
module attributes {stable_mosaic.version = 11 : i64} {
  func.func @_elementwise_kernel(%arg0: i32, %arg1: memref<8x256xf32, #tpu.memory_space<vmem>>, %arg2: memref<8x256xf32, #tpu.memory_space<vmem>>) attributes {dimension_semantics = [#tpu.dimension_semantics<parallel>], iteration_bounds = array<i64: 1>, scalar_prefetch = 0 : i64, scratch_operands = 0 : i64, tpu.core_type = #tpu.core_type<tc>, window_params = [{transform_indices = @transform_0, window_bounds = array<i64: 8, 256>}, {transform_indices = @transform_1, window_bounds = array<i64: 8, 256>}]} {
    %c0 = arith.constant 0 : index
    %c0_0 = arith.constant 0 : index
    %0 = vector.load %arg1[%c0, %c0_0] : memref<8x256xf32, #tpu.memory_space<vmem>>, vector<8x256xf32>
    %cst = arith.constant 0.000000e+00 : f32
    %1 = vector.broadcast %cst : f32 to vector<8x256xf32>
    %2 = arith.cmpf oge, %0, %1 : vector<8x256xf32>
    %cst_1 = arith.constant 1.500000e-01 : f32
    %3 = vector.broadcast %cst_1 : f32 to vector<8x256xf32>
    %4 = arith.mulf %3, %0 : vector<8x256xf32>
    %5 = arith.select %2, %0, %4 : vector<8x256xi1>, vector<8x256xf32>
    %c0_2 = arith.constant 0 : index
    %c0_3 = arith.constant 0 : index
    %6 = vector.load %arg2[%c0_2, %c0_3] : memref<8x256xf32, #tpu.memory_space<vmem>>, vector<8x256xf32>
    tpu.vector_store %arg2[%c0_2, %c0_3], %5 {strides = array<i32>} : memref<8x256xf32, #tpu.memory_space<vmem>>, vector<8x256xf32>,
    return
  }
  func.func @transform_0(%arg0: i32) -> (i32, i32) {
    %c0_i32 = arith.constant 0 : i32
    %c0_i32_0 = arith.constant 0 : i32
    return %arg0, %c0_i32 : i32, i32
  }
  func.func @transform_1(%arg0: i32) -> (i32, i32) {
    %c0_i32 = arith.constant 0 : i32
    %c0_i32_0 = arith.constant 0 : i32
    return %arg0, %c0_i32 : i32, i32
  }
}

</mosaic_0001>

<bundles_post_ra>
// kernel: tpu_custom_call.1
= control target key start
LH: loop header
LB: loop body
LE: loop exit
PB: predicated region body
PF: predicated region fallthrough
CT: control target
= control target key end

     0   :  { %6 = vsyncpa [#allocation3], 0  ;;  %s132_s0 = inlined_call_operand.hbm [shape: f32[8,256], index: 0, kind: input, shape index: {}]   ;;  %s133_s1 = inlined_call_operand.hbm [shape: f32[8,256], index: 1, kind: output, shape index: {}]  }
   0x1   :  { %7 = vsyncpa [#allocation4], 0  ;;  %s96_s6 = smov [#allocation2]   ;;  %s48_s10 = scalar_lea.hbm %s132_s0, 256 }
   0x2   :  { %s14_s7 = sshll.u32 %s96_s6, 4  ;;  %p49_p0 = scmp.ne.s32.totalorder %s132_s0, %s48_s10  ;;  %s15_s7 = int_to_ptr.vmem [resolvable:$true] %s14_s7 }
   0x3   :  { %p52_p1 = scmp.lt.u32.totalorder %s48_s10, %s132_s0 }
   0x5   :  { %p54_p2 = pnand %p52_p1, %p49_p0 }
   0x7   :  { %57 = shalt.err (!%p54_p2)
}
   0x8   :  { %s58_s15 = scalar_lea.vmem %s15_s7, 256  ;;  %p63_p4 = scmp.lt.s32.totalorder %s15_s7, %s15_s7 }
   0x9   :  { %p59_p3 = scmp.ne.s32.totalorder %s15_s7, %s58_s15  ;;  %p64_p5 = scmp.lt.s32.totalorder %s58_s15, %s58_s15 }
   0xb   :  { %p65_p6 = por %p64_p5, %p63_p4 }
   0xd   :  { %p66_p7 = pnand %p65_p6, %p59_p3 }
   0xf   :  { %69 = shalt.err (!%p66_p7)
}
  0x10   :  { %17 = dma.hbm_to_vmem [thread:$0]  %s132_s0, 256, %s15_s7, [#allocation3]  }
  0x11   :  { %92 = dma.done.wait [#allocation3], 256  }
  0x12   :  { %93 = vsyncadd [#allocation3], 4294967040  ;;  %s97_s18 = smov [#allocation5]   ;;  %v21_v0 = vld [vmem:[#allocation2] sm:$0xff]  ;;  %v22_v1 = vld [vmem:[#allocation2 + $0x8] sm:$0xff] }
  0x13   :  { %s37_s19 = sshll.u32 %s97_s18, 4  ;;  %vm23_vm0 = vcmp.ge.f32.partialorder %v21_v0, 0.0  ;;  %v25_v2 = vmul.f32 0.15, %v21_v0  ;;  %vm24_vm1 = vcmp.ge.f32.partialorder %v22_v1, 0.0  ;;  %s38_s19 = int_to_ptr.vmem [resolvable:$true] %s37_s19 }
  0x14   :  { %v26_v3 = vmul.f32 0.15, %v22_v1  ;;  %s70_s20 = scalar_lea.vmem %s38_s19, 256  ;;  %p75_p9 = scmp.lt.s32.totalorder %s38_s19, %s38_s19 }
  0x15   :  { %v27_v4 = vsel %vm23_vm0, %v21_v0, %v25_v2  ;;  %p71_p8 = scmp.ne.s32.totalorder %s38_s19, %s70_s20  ;;  %p76_p10 = scmp.lt.s32.totalorder %s70_s20, %s70_s20 }
  0x16   :  { %v28_v5 = vsel %vm24_vm1, %v22_v1, %v26_v3  ;;  %29 = vst [vmem:[#allocation5] sm:$0xff] %v27_v4 }
  0x17   :  { %30 = vst [vmem:[#allocation5 + $0x8] sm:$0xff] %v28_v5  ;;  %p77_p11 = por %p76_p10, %p75_p9 }
  0x19   :  { %p78_p12 = pnand %p77_p11, %p71_p8 }
  0x1b   :  { %81 = shalt.err (!%p78_p12)
}
  0x1c   :  { %s82_s22 = scalar_lea.hbm %s133_s1, 256 }
  0x1d   :  { %p83_p13 = scmp.ne.s32.totalorder %s133_s1, %s82_s22  ;;  %p86_p0 = scmp.lt.u32.totalorder %s82_s22, %s133_s1 }
  0x1f   :  { %p88_p1 = pnand %p86_p0, %p83_p13 }
  0x21   :  { %91 = shalt.err (!%p88_p1)
}
  0x22   :  { %40 = dma.vmem_to_hbm [thread:$0]  %s38_s19, 256, %s133_s1, [#allocation4]  }
  0x23   :  { %94 = dma.done.wait [#allocation4], 256  }
  0x24   :  { %95 = vsyncadd [#allocation4], 4294967040 }
  0x25   :  { %44 = vsyncpa [#allocation3], 1 }
  0x26   :  { %45 = vsyncpa [#allocation4], 1 }

</bundles_post_ra>
